<compile_context>
chip_gen: v5e
topology: v5e:2x2
jax: 0.10.0
libtpu: 0.0.40
codegen_flags: <defaults>
</compile_context>

<pallas_src>
import functools

import jax
import jax.numpy as jnp
from jax.experimental import pallas as pl
from jax.experimental.pallas import tpu as pltpu

BINS = 8.0
MAX_CLIP = 0.95
QMAX = BINS - 1.0          # 7


def _round_up(a, b):
    return (a + b - 1) // b * b


# --------------------------------------------------------------------------------------
# Kernel
# --------------------------------------------------------------------------------------
def _quant_conv_kernel(scale_ref, v_ref, wc_ref, b_ref, o_ref):
    """One (Coutp, TM) output tile of the quantized conv, expressed as a transposed GEMM.

    scale_ref : SMEM (1,)      f32   combined scale x_sf * w_sf
    v_ref     : VMEM (K, TM)   f32   activation patches, already divided by x_sf
    wc_ref    : VMEM (Coutp,K) bf16  pre-quantized weight codes in [-7, 7]
    b_ref     : VMEM (Coutp,1) f32   bias (broadcast along lanes)
    o_ref     : VMEM (Coutp,TM) f32  output tile (Cout on sublanes, M on lanes)
    """
    # Activation quantization codes in [-7, 7]; integers <= 7 are exact in bf16, so the
    # bf16 matmul with f32 accumulation is bit-exact while using the fast MXU path.
    xc = jnp.clip(jnp.floor(v_ref[...] + 0.5), -QMAX, QMAX).astype(jnp.bfloat16)
    acc = jnp.dot(wc_ref[...], xc, preferred_element_type=jnp.float32)
    o_ref[...] = acc * scale_ref[0] + b_ref[...]


# --------------------------------------------------------------------------------------
# Wrapper helpers
# --------------------------------------------------------------------------------------
def _im2col_t(v_nchw, kh, kw, padding):
    """Patches in (K, M) layout with K = Cin*KH*KW ordered (ci, i, j) to match
    weight.reshape(Cout, K), and M = N*OH*OW flattened with n outermost."""
    n, c, h, w = v_nchw.shape
    vp = jnp.pad(v_nchw, ((0, 0), (0, 0), (padding, padding), (padding, padding)))
    oh = h + 2 * padding - kh + 1
    ow = w + 2 * padding - kw + 1
    cols = [vp[:, :, i:i + oh, j:j + ow] for i in range(kh) for j in range(kw)]
    p = jnp.stack(cols, axis=2)            # (N, Cin, KH*KW, OH, OW)
    p = p.transpose(1, 2, 0, 3, 4)         # (Cin, KH*KW, N, OH, OW) — leading-axis swap
    return p.reshape(c * kh * kw, n * oh * ow), oh, ow


def _vmem_capacity_bytes():
    try:
        return int(pltpu.get_tpu_info().vmem_capacity_bytes)
    except Exception:
        return 64 * 1024 * 1024            # v7x floor: safe on every generation


def _choose_tm(m, k, coutp):
    """Lane-tile (M) size: as big as the per-generation VMEM budget allows (capped at
    2048 — amortizes the ~0.35us per-grid-step overhead), while keeping >= 2 'parallel'
    grid steps whenever M >= 256 so both v7x TensorCores are used."""
    budget = _vmem_capacity_bytes() // 4                     # generous headroom
    per_col = 2 * 4 * (k + coutp)                            # dbl-buffered f32 patch+out cols
    tm = min(2048, max(128, (budget // per_col) // 128 * 128))
    m128 = _round_up(m, 128)
    if m128 >= 256:
        tm = min(tm, max(128, _round_up(pl.cdiv(m128, 2), 128)))
    else:
        tm = 128
    return tm


# --------------------------------------------------------------------------------------
# Public entry point
# --------------------------------------------------------------------------------------
@functools.partial(jax.jit, static_argnames=("padding",))
def quant_conv2d(x, weight, bias, padding=1):
    """x: (N, Cin, H, W); weight: (Cout, Cin, KH, KW); bias: (Cout,). Returns NCHW f32."""
    n, cin, h, w = x.shape
    cout, _, kh, kw = weight.shape
    k = cin * kh * kw

    # Cheap scalar setup (plain JAX): abs-max scale factors, guarded against all-zero input.
    tiny = jnp.float32(jnp.finfo(jnp.float32).tiny)
    x32 = x.astype(jnp.float32)
    w32 = weight.astype(jnp.float32)
    x_sf = jnp.maximum(MAX_CLIP * jnp.max(jnp.abs(x32)) / BINS, tiny)
    w_sf = jnp.maximum(MAX_CLIP * jnp.max(jnp.abs(w32)) / BINS, tiny)
    scale = (x_sf * w_sf).astype(jnp.float32).reshape(1)

    # Fold the activation scale BEFORE im2col: one exact division over the un-expanded
    # input (bit-identical to the module's x / x_sf), so the kernel needs no per-element
    # divide or reciprocal-multiply — only floor/clip/cast on the patch tile.
    v = x32 / x_sf
    pat_t, oh, ow = _im2col_t(v, kh, kw, padding)            # (K, M), M = N*OH*OW
    m = pat_t.shape[1]

    # Pre-quantize the tiny weight tensor once in the wrapper: bf16 codes in [-7, 7].
    coutp = _round_up(cout, 8)                               # sublane pad only (8, not 128)
    wc = jnp.clip(jnp.floor(w32 / w_sf + 0.5), -QMAX, QMAX).reshape(cout, k)
    wc = jnp.pad(wc, ((0, coutp - cout), (0, 0))).astype(jnp.bfloat16)
    b2d = jnp.pad(bias.astype(jnp.float32).reshape(cout, 1), ((0, coutp - cout), (0, 0)))

    tm = _choose_tm(m, k, coutp)
    mp = _round_up(m, tm)
    pat_t = jnp.pad(pat_t, ((0, 0), (0, mp - m)))            # padded cols quantize to code 0

    cp_kwargs = dict(dimension_semantics=("parallel",))
    vmem_need = 2 * tm * 4 * (k + coutp) + k * coutp * 2 + coutp * 4
    if vmem_need > (24 << 20):                               # only raise above the default
        cp_kwargs["vmem_limit_bytes"] = int(min(_vmem_capacity_bytes(), 2 * vmem_need))

    out2d = pl.pallas_call(
        _quant_conv_kernel,
        out_shape=jax.ShapeDtypeStruct((coutp, mp), jnp.float32),
        grid=(mp // tm,),
        in_specs=[
            pl.BlockSpec(memory_space=pltpu.MemorySpace.SMEM),   # scale (1,)
            pl.BlockSpec((k, tm), lambda i: (0, i)),             # patch tile (M on lanes)
            pl.BlockSpec((coutp, k), lambda i: (0, 0)),          # weight codes (resident)
            pl.BlockSpec((coutp, 1), lambda i: (0, 0)),          # bias
        ],
        out_specs=pl.BlockSpec((coutp, tm), lambda i: (0, i)),
        compiler_params=pltpu.CompilerParams(**cp_kwargs),
    )(scale, pat_t, wc, b2d)

    # (Cout, M) -> (N, Cout, OH, OW): cheap leading-axis swap, no lane-moving transpose.
    out = out2d[:cout, :m].reshape(cout, n, oh, ow).transpose(1, 0, 2, 3)
    return out


# --------------------------------------------------------------------------------------
# Pure-JAX reference (same quantize-then-conv semantics as the PyTorch module)
# --------------------------------------------------------------------------------------
def _quantize(v, sf):
    max_value = sf * (BINS - 1.0)
    return jnp.clip(sf * jnp.floor(v / sf + 0.5), -max_value, max_value)


def _reference(x, weight, bias, padding=1):
    tiny = jnp.float32(jnp.finfo(jnp.float32).tiny)
    x_sf = jnp.maximum(MAX_CLIP * jnp.max(jnp.abs(x)) / BINS, tiny)
    w_sf = jnp.maximum(MAX_CLIP * jnp.max(jnp.abs(weight)) / BINS, tiny)
    xq = _quantize(x, x_sf)
    wq = _quantize(weight, w_sf)
    out = jax.lax.conv_general_dilated(
        xq, wq, window_strides=(1, 1), padding=[(padding, padding)] * 2,
        dimension_numbers=("NCHW", "OIHW", "NCHW"),
        precision=jax.lax.Precision.HIGHEST)
    return out + bias.reshape(1, -1, 1, 1)


if __name__ == "__main__":
    # Module config: QuantConv2d(in_channels=4, out_channels=8, kernel_size=3,
    #                            stride=1, padding=1, bias=True)
    N, Cin, H, W = 2, 4, 16, 16
    Cout, KH, KW = 8, 3, 3

    key = jax.random.PRNGKey(0)
    kx, kw_ = jax.random.split(key)
    x = jax.random.normal(kx, (N, Cin, H, W), dtype=jnp.float32)

    # Deterministic kaiming-uniform-like init (relu gain): U(-b, b), b = sqrt(6/fan_in)
    fan_in = Cin * KH * KW
    bound = (6.0 / fan_in) ** 0.5
    weight = jax.random.uniform(kw_, (Cout, Cin, KH, KW), dtype=jnp.float32,
                                minval=-bound, maxval=bound)
    bias = jnp.zeros((Cout,), dtype=jnp.float32)     # module zero-inits bias

    out = jax.block_until_ready(quant_conv2d(x, weight, bias, padding=1))
    ref = _reference(x, weight, bias, padding=1)

    assert out.shape == (N, Cout, H, W), out.shape
    assert jnp.allclose(out, ref, atol=1e-3, rtol=1e-3), "mismatch vs reference conv"
    print("KERNEL_OK")
</pallas_src>

<mosaic_0001>
module attributes {stable_mosaic.version = 11 : i64} {
  func.func @_quant_conv_kernel(%arg0: i32, %arg1: memref<1xf32, #tpu.memory_space<smem>>, %arg2: memref<36x256xf32, #tpu.memory_space<vmem>>, %arg3: memref<8x36xbf16, #tpu.memory_space<vmem>>, %arg4: memref<8x1xf32, #tpu.memory_space<vmem>>, %arg5: memref<8x256xf32, #tpu.memory_space<vmem>>) attributes {dimension_semantics = [#tpu.dimension_semantics<parallel>], iteration_bounds = array<i64: 2>, scalar_prefetch = 0 : i64, scratch_operands = 0 : i64, tpu.core_type = #tpu.core_type<tc>, window_params = [{transform_indices = @transform_0, window_bounds = array<i64: 1>}, {transform_indices = @transform_1, window_bounds = array<i64: 36, 256>}, {pipeline_mode = #tpu.pipeline_mode<synchronous>, transform_indices = @transform_2, window_bounds = array<i64: 8, 36>}, {pipeline_mode = #tpu.pipeline_mode<synchronous>, transform_indices = @transform_3, window_bounds = array<i64: 8, 1>}, {transform_indices = @transform_4, window_bounds = array<i64: 8, 256>}]} {
    %c0 = arith.constant 0 : index
    %c0_0 = arith.constant 0 : index
    %0 = vector.load %arg2[%c0, %c0_0] : memref<36x256xf32, #tpu.memory_space<vmem>>, vector<36x256xf32>
    %cst = arith.constant 5.000000e-01 : f32
    %1 = vector.broadcast %cst : f32 to vector<36x256xf32>
    %2 = arith.addf %0, %1 : vector<36x256xf32>
    %3 = math.floor %2 : vector<36x256xf32>
    %cst_1 = arith.constant -7.000000e+00 : f32
    %cst_2 = arith.constant 7.000000e+00 : f32
    %4 = vector.broadcast %cst_1 : f32 to vector<36x256xf32>
    %5 = arith.maximumf %4, %3 : vector<36x256xf32>
    %6 = vector.broadcast %cst_2 : f32 to vector<36x256xf32>
    %7 = arith.minimumf %6, %5 : vector<36x256xf32>
    %8 = arith.truncf %7 : vector<36x256xf32> to vector<36x256xbf16>
    %c0_3 = arith.constant 0 : index
    %c0_4 = arith.constant 0 : index
    %9 = vector.load %arg3[%c0_3, %c0_4] : memref<8x36xbf16, #tpu.memory_space<vmem>>, vector<8x36xbf16>
    %cst_5 = arith.constant dense<0.000000e+00> : vector<8x256xf32>
    %10 = tpu.matmul %9, %8, %cst_5 {dimension_numbers = #tpu.dot_dimension_numbers<[1], [0], [0], [1], [0, 0, 1, 1], [], []>} : vector<8x36xbf16>, vector<36x256xbf16>, vector<8x256xf32> -> vector<8x256xf32>
    %c0_6 = arith.constant 0 : index
    %11 = memref.load %arg1[%c0_6] : memref<1xf32, #tpu.memory_space<smem>>
    %12 = vector.broadcast %11 : f32 to vector<8x256xf32>
    %13 = arith.mulf %10, %12 : vector<8x256xf32>
    %c0_7 = arith.constant 0 : index
    %c0_8 = arith.constant 0 : index
    %14 = vector.load %arg4[%c0_7, %c0_8] : memref<8x1xf32, #tpu.memory_space<vmem>>, vector<8x1xf32>
    %15 = vector.broadcast %14 : vector<8x1xf32> to vector<8x256xf32>
    %16 = arith.addf %13, %15 : vector<8x256xf32>
    %c0_9 = arith.constant 0 : index
    %c0_10 = arith.constant 0 : index
    %17 = vector.load %arg5[%c0_9, %c0_10] : memref<8x256xf32, #tpu.memory_space<vmem>>, vector<8x256xf32>
    tpu.vector_store %arg5[%c0_9, %c0_10], %16 {strides = array<i32>} : memref<8x256xf32, #tpu.memory_space<vmem>>, vector<8x256xf32>,
    return
  }
  func.func @transform_0(%arg0: i32) -> i32 {
    %c0_i32 = arith.constant 0 : i32
    %c0_i32_0 = arith.constant 0 : i32
    return %c0_i32 : i32
  }
  func.func @transform_1(%arg0: i32) -> (i32, i32) {
    %c0_i32 = arith.constant 0 : i32
    %c0_i32_0 = arith.constant 0 : i32
    return %c0_i32, %arg0 : i32, i32
  }
  func.func @transform_2(%arg0: i32) -> (i32, i32) {
    %c0_i32 = arith.constant 0 : i32
    %c0_i32_0 = arith.constant 0 : i32
    %c0_i32_1 = arith.constant 0 : i32
    return %c0_i32, %c0_i32_0 : i32, i32
  }
  func.func @transform_3(%arg0: i32) -> (i32, i32) {
    %c0_i32 = arith.constant 0 : i32
    %c0_i32_0 = arith.constant 0 : i32
    %c0_i32_1 = arith.constant 0 : i32
    return %c0_i32, %c0_i32_0 : i32, i32
  }
  func.func @transform_4(%arg0: i32) -> (i32, i32) {
    %c0_i32 = arith.constant 0 : i32
    %c0_i32_0 = arith.constant 0 : i32
    return %c0_i32, %arg0 : i32, i32
  }
}

</mosaic_0001>

<bundles_post_ra>
// kernel: quant_conv2d.1
= control target key start
LH: loop header
LB: loop body
LE: loop exit
PB: predicated region body
PF: predicated region fallthrough
CT: control target
= control target key end

     0   :  { %s575_s0 = inlined_call_operand.<no memory space> [shape: f32[1], index: 0, kind: input, shape index: {}]   ;;  %s576_s1 = inlined_call_operand.vmem [shape: f32[36,512], index: 1, kind: input, shape index: {}]   ;;  %s577_s2 = inlined_call_operand.vmem [shape: bf16[8,36], index: 2, kind: input, shape index: {}]   ;;  %s578_s3 = inlined_call_operand.vmem [shape: f32[8,1], index: 3, kind: input, shape index: {}]   ;;  %s579_s4 = inlined_call_operand.vmem [shape: f32[8,512], index: 4, kind: output, shape index: {}]  }
   0x1   :  { %9 = sst [smem:[#allocation2]] %s575_s0 }
   0x2   :  { %s515_s17 = smov 0   ;;  %s517_s18 = smov 0  }
   0x3   :  { %s519_s19 = smov 0  }
   0x4 LB: > { %s410_s0 = sadd.s32 4294967295, %s484_s19   ;;  %s532_s20 = sadd.s32 1, %s484_s19   ;;  %s484_s19 = sphi %s519_s19, %s582_s19   ;;  %s480_s18 = sphi %s517_s18, %s581_s18   ;;  %s476_s17 = sphi %s515_s17, %s580_s17  }
   0x5   : > { %s40_s21 = ssub.s32 %s484_s19, %s532_s20  ;;  %s43_s22 = sadd.s32 1, %s480_s18 }
   0x6   : > { %p41_p0 = scmp.eq.s32.totalorder %s40_s21, 0  ;;  %p50_p1 = scmp.ne.s32.totalorder %s480_s18, %s476_s17 }
   0x7   : > { %p51_p2 = scmp.eq.s32.totalorder %s484_s19, 0  ;;  %p413_p4 = scmp.ge.s32.totalorder %s484_s19, 2 }
   0x8   : > { %s541_s23 = scalar_select %p41_p0, %s480_s18, %s43_s22  }
   0x9   : > { %p52_p3 = por %p51_p2, %p50_p1  ;;  %153 = sbr.rel (%p413_p4) target bundleno = 28 (0x1c), region = 28 }
   0xe   : > { %156 = sbr.rel (!%p52_p3) target bundleno = 28 (0x1c), region = 32  ;;  %s158_s24 = sand.u32 (%p52_p3), 1, %s480_s18  }
   0xf   : > { %s433_s25 = sshll.u32 (%p52_p3), %s484_s19, 4  ;;  %s434_s26 = smul.u32 (%p52_p3), 80, %s158_s24 }
  0x10   : > { %s163_s29 = scalar_lea.vmem (%p52_p3), %s576_s1, %s433_s25 }
  0x11   : > { %v176_v0 = vld [vmem:[%s163_s29] sm:$0xff] (%p52_p3)  ;;  %v178_v1 = vld [vmem:[%s163_s29 + $0x8] sm:$0xff] (%p52_p3)  ;;  %s160_s30 = scalar_lea.vmem (%p52_p3), [#allocation3], %s434_s26 }
  0x12   : > { %v180_v2 = vld [vmem:[%s163_s29 + $0x20] sm:$0xff] (%p52_p3)  ;;  %177 = vst [vmem:[%s160_s30] sm:$0xff] (%p52_p3), %v176_v0  ;;  %v182_v3 = vld [vmem:[%s163_s29 + $0x28] sm:$0xff] (%p52_p3) }
  0x13   : > { %179 = vst [vmem:[%s160_s30 + $0x8] sm:$0xff] %v178_v1  ;;  %v184_v4 = vld [vmem:[%s163_s29 + $0x40] sm:$0xff]  ;;  %v186_v5 = vld [vmem:[%s163_s29 + $0x48] sm:$0xff] }
  0x14   : > { %181 = vst [vmem:[%s160_s30 + $0x10] sm:$0xff] %v180_v2  ;;  %v188_v6 = vld [vmem:[%s163_s29 + $0x60] sm:$0xff]  ;;  %v190_v7 = vld [vmem:[%s163_s29 + $0x68] sm:$0xff] }
  0x15   : > { %183 = vst [vmem:[%s160_s30 + $0x18] sm:$0xff] %v182_v3  ;;  %v192_v8 = vld [vmem:[%s163_s29 + $0x80] sm:$0xff]  ;;  %v194_v9 = vld [vmem:[%s163_s29 + $0x88] sm:$0xff] }
  0x16   : > { %185 = vst [vmem:[%s160_s30 + $0x20] sm:$0xff] %v184_v4 }
  0x17   : > { %187 = vst [vmem:[%s160_s30 + $0x28] sm:$0xff] %v186_v5 }
  0x18   : > { %189 = vst [vmem:[%s160_s30 + $0x30] sm:$0xff] %v188_v6 }
  0x19   : > { %191 = vst [vmem:[%s160_s30 + $0x38] sm:$0xff] %v190_v7 }
  0x1a   : > { %193 = vst [vmem:[%s160_s30 + $0x40] sm:$0xff] %v192_v8 }
  0x1b   : > { %195 = vst [vmem:[%s160_s30 + $0x48] sm:$0xff] %v194_v9 }
  0x1c PF: > { %p416_p5 = scmp.ge.s32.totalorder %s484_s19, 1  ;;  %p200_p6 = scmp.lt.s32.totalorder %s484_s19, 3 }
  0x1e   : > { %p201_p7 = pnand %p416_p5, %p200_p6 }
  0x1f   : > { %s207_s5 = sand.u32 (!%p201_p7), 1, %s476_s17   ;;  %s417_s12 = sshll.u32 (!%p201_p7), %s410_s0, 1 }
  0x20   : > { %204 = sbr.rel (%p201_p7) target bundleno = 193 (0xc1), region = 55  ;;  %s334_s13 = sld [smem:[#allocation2]] (!%p201_p7) }
  0x21   : > { %s435_s6 = smul.u32 (!%p201_p7), 80, %s207_s5  ;;  %p234_p8 = scmp.lt.s32.totalorder (!%p201_p7), %s417_s12, 3 }
  0x23   : > { %s209_s9 = scalar_lea.vmem (!%p201_p7), [#allocation3], %s435_s6 }
  0x25   : > { %v486_v10 = vmov 0   ;;  %v338_v11 = vld [vmem:[%s578_s3] sm:$0xff]  ;;  %v249_v13 = vld [vmem:[%s209_s9 + $0x48] sm:$0xf]  ;;  %v247_v20 = vld [vmem:[%s209_s9 + $0x38] sm:$0xff]  ;;  %vm301_vm0 = vcmask 1041408  }
  0x26   : > { %461 = vset.pattern.permute.xlu0 %v486_v10  ;;  %v248_v12 = vld [vmem:[%s209_s9 + $0x40] sm:$0xf]  ;;  %v259_v16 = vadd.f32 0.5, %v249_v13  ;;  %v246_v17 = vld [vmem:[%s209_s9 + $0x30] sm:$0xff]  ;;  %v245_v19 = vld [vmem:[%s209_s9 + $0x28] sm:$0xff]  ;;  %v257_v23 = vadd.f32 0.5, %v247_v20  ;;  %v335_v61 = vstv %s334_s13 }
  0x27   : > { %341 = vperm.xlu0 %461, %v338_v11   ;;  %v244_v14 = vld [vmem:[%s209_s9 + $0x20] sm:$0xff]  ;;  %v258_v15 = vadd.f32 0.5, %v248_v12  ;;  %v256_v21 = vadd.f32 0.5, %v246_v17  ;;  %v255_v22 = vadd.f32 0.5, %v245_v19  ;;  %v242_v25 = vld [vmem:[%s209_s9 + $0x10] sm:$0xff]  ;;  %v241_v34 = vld [vmem:[%s209_s9 + $0x8] sm:$0xff] }
  0x28   : > { %v254_v18 = vadd.f32 0.5, %v244_v14  ;;  %v240_v24 = vld [vmem:[%s209_s9] sm:$0xff]  ;;  %v269_v27 = vfloor.f32 %v259_v16  ;;  %v267_v32 = vfloor.f32 %v257_v23  ;;  %v252_v33 = vadd.f32 0.5, %v242_v25  ;;  %v243_v39 = vld [vmem:[%s209_s9 + $0x18] sm:$0xff]  ;;  %s584_s12 = smov (!%p234_p8, %s417_s12), 3 }
  0x29   : > { %v268_v26 = vfloor.f32 %v258_v15  ;;  %v250_v29 = vadd.f32 0.5, %v240_v24  ;;  %v266_v30 = vfloor.f32 %v256_v21  ;;  %v265_v31 = vfloor.f32 %v255_v22  ;;  %v296_v60 = vld [vmem:[%s577_s2] sm:$0xf]  ;;  %s418_s14 = sshll.u32 %s584_s12, 3 }
  0x2a   : > { %v264_v28 = vfloor.f32 %v254_v18  ;;  %v428_v36 = vclamps-f32 %v269_v27, 7.0  ;;  %v426_v42 = vclamps-f32 %v267_v32, 7.0  ;;  %v262_v43 = vfloor.f32 %v252_v33  ;;  %s237_s17 = scalar_lea.vmem %s579_s4, %s418_s14 }
  0x2b   : > { %v427_v35 = vclamps-f32 %v268_v26, 7.0  ;;  %v260_v38 = vfloor.f32 %v250_v29  ;;  %v425_v40 = vclamps-f32 %v266_v30, 7.0  ;;  %v424_v41 = vclamps-f32 %v265_v31, 7.0 }
  0x2c   : > { %v423_v37 = vclamps-f32 %v264_v28, 7.0  ;;  %v295_v45 = vpack.c.bf16 %v428_v36, %v428_v36  ;;  %v251_v46 = vadd.f32 0.5, %v241_v34  ;;  %v253_v47 = vadd.f32 0.5, %v243_v39 }
  0x2d   : > { %v294_v44 = vpack.c.bf16 %v427_v35, %v427_v35  ;;  %v419_v50 = vclamps-f32 %v260_v38, 7.0  ;;  %v293_v53 = vpack.c.bf16 %v426_v42, %v424_v41  ;;  %v421_v54 = vclamps-f32 %v262_v43, 7.0 }
  0x2e   : > { %v306_v49 = vsel %vm301_vm0, %v295_v45, 0  ;;  %v261_v51 = vfloor.f32 %v251_v46  ;;  %v292_v52 = vpack.c.bf16 %v425_v40, %v423_v37  ;;  %v263_v55 = vfloor.f32 %v253_v47 }
  0x2f   : > { %v303_v48 = vsel %vm301_vm0, %v294_v44, 0  ;;  %326 = vmatpush.bf16.msra.mxu1 %v306_v49  ;;  %v290_v58 = vpack.c.bf16 %v421_v54, %v419_v50  ;;  %vm297_vm1 = vcmask 293888  }
  0x30   : > { %313 = vmatpush.bf16.msra.mxu0 %v303_v48  ;;  %v420_v56 = vclamps-f32 %v261_v51, 7.0  ;;  %v422_v57 = vclamps-f32 %v263_v55, 7.0 }
  0x32   : > { %v291_v59 = vpack.c.bf16 %v422_v57, %v420_v56 }
  0x33   : > { %327 = vmatpush.bf16.msra.mxu1 %v293_v53 }
  0x34   : > { %314 = vmatpush.bf16.msra.mxu0 %v292_v52 }
  0x37   : > { %328 = vmatpush.bf16.msra.mxu1 %v291_v59 }
  0x38   : > { %315 = vmatpush.bf16.msra.mxu0 %v290_v58 }
  0x3a   : > { %430 = vmatmul.msk.bf16.vlgmr.msra.gmra.mxu1 %vm297_vm1, %v296_v60 }
  0x3b   : > { %429 = vmatmul.msk.bf16.vlgmr.msra.gmra.mxu0 %vm297_vm1, %v296_v60 }
  0x99   : > { %v342_v62 = vpop.permute.xlu0 %341 }
  0xb7   : > { %v330_v0 = vpop.f32.mrf.mxu1 }
  0xb8   : > { %v317_v63 = vpop.f32.mrf.mxu0  ;;  %v337_v2 = vmul.f32 %v335_v61, %v330_v0 }
  0xb9   : > { %v336_v1 = vmul.f32 %v335_v61, %v317_v63 }
  0xba   : > { %v345_v4 = vadd.f32 %v342_v62, %v337_v2 }
  0xbb   : > { %v344_v3 = vadd.f32 %v342_v62, %v336_v1 }
  0xbc   : > { %347 = vst [vmem:[%s237_s17 + $0x8] sm:$0xff] %v345_v4 }
  0xbd   : > { %346 = vst [vmem:[%s237_s17] sm:$0xff] %v344_v3 }
  0xbf   : > { %v332_v6 = vpop.f32.mrf.mxu1 }
  0xc0   : > { %v319_v5 = vpop.f32.mrf.mxu0 }
  0xc1 PF: > { %p12_p9 = scmp.ge.s32.totalorder %s532_s20, 4   ;;  %s580_s17 = smov %s480_s18 }
  0xc2   : > { %s581_s18 = smov %s541_s23  ;;  %s582_s19 = smov %s532_s20 }
  0xc3   :  { %14 = sbr.rel (!%p12_p9) target bundleno = 4 (0x4), region = 94 }

</bundles_post_ra>
